<compile_context>
chip_gen: v7x
topology: tpu7x:2x2x1
jax: 0.10.0
libtpu: 0.0.40
codegen_flags: <defaults>
</compile_context>

<pallas_src>
import functools

import jax
import jax.numpy as jnp
from jax import lax
from jax.experimental import pallas as pl
from jax.experimental.pallas import tpu as pltpu


def _spatial_attention_kernel(x_ref, w_ref, phi_ref, out_ref,
                              m_scr, l_scr, p_scr,
                              *, num_maps, batch_tile, row_stride):
    # x_ref:   (Bt, C, hw_tile)  batch-tile of features, spatial axis lane-major
    # w_ref:   (M, C)            attention 1x1-conv weight (x's dtype)
    # phi_ref: (4M, C)           contact 1x1-conv weight, k-major rows (row k*M + m)
    # out_ref: (Bt, 4)           contact scores (written on the last hw tile)
    # scratch (f32): m_scr (Bt*R, 1) running max, l_scr (Bt*R, 1) running denom,
    #                p_scr (Bt*R, C) running attention-pooled features, R=row_stride
    M = num_maps
    Bt = batch_tile
    R = row_stride
    t = pl.program_id(1)

    @pl.when(t == 0)
    def _init():
        m_scr[...] = jnp.full(m_scr.shape, -jnp.inf, dtype=m_scr.dtype)
        l_scr[...] = jnp.zeros(l_scr.shape, dtype=l_scr.dtype)
        p_scr[...] = jnp.zeros(p_scr.shape, dtype=p_scr.dtype)

    w = w_ref[...]                                     # (M, C) -- hoisted out of bt loop
    for bt in range(Bt):                               # static unroll over the batch tile
        lo, hi = bt * R, bt * R + M                    # 8-aligned per-bt scratch rows
        x = x_ref[bt]                                  # (C, hw): feeds both matmuls directly
        # Attention logits: small MXU matmul (only M output rows), f32 accumulation.
        logits = jnp.dot(w, x, preferred_element_type=jnp.float32)       # (M, hw)

        # Online (streaming) softmax statistics over the HW axis (lane reduces).
        m_prev = m_scr[lo:hi, :]                                         # (M, 1)
        local_max = jnp.max(logits, axis=-1, keepdims=True)              # (M, 1)
        m_new = jnp.maximum(m_prev, local_max)                           # (M, 1)
        alpha = jnp.exp(m_prev - m_new)                                  # (M, 1)
        e = jnp.exp(logits - m_new)                                      # (M, hw) unnormalized

        l_scr[lo:hi, :] = alpha * l_scr[lo:hi, :] + jnp.sum(e, axis=-1, keepdims=True)

        # Attention-pooled features: e @ x^T on the MXU (contract over the hw tile,
        # deep K = hw_tile).  phi is applied only once, in the finalize.
        p_upd = lax.dot_general(e.astype(x.dtype), x,
                                dimension_numbers=(((1,), (1,)), ((), ())),
                                preferred_element_type=jnp.float32)      # (M, C)
        p_scr[lo:hi, :] = alpha * p_scr[lo:hi, :] + p_upd
        m_scr[lo:hi, :] = m_new

    @pl.when(t == pl.num_programs(1) - 1)
    def _finalize():
        phi = phi_ref[...].astype(jnp.float32)                           # (4M, C), k-major
        rows = []
        for bt in range(Bt):
            lo, hi = bt * R, bt * R + M
            inv_l = 1.0 / l_scr[lo:hi, :]                                # exact reciprocal
            p_norm = p_scr[lo:hi, :] * inv_l                             # (M, C) pooled feats
            cols = []
            for k in range(4):
                prod = phi[k * M:(k + 1) * M, :] * p_norm                # (M, C)
                col = jnp.sum(jnp.sum(prod, axis=-1, keepdims=True),
                              axis=0, keepdims=True)                     # (1, 1) = sum_m,c
                cols.append(col)
            rows.append(jnp.concatenate(cols, axis=1))                   # (1, 4)
        out = rows[0] if Bt == 1 else jnp.concatenate(rows, axis=0)      # (Bt, 4)
        out_ref[...] = out * jnp.float32(1.0 / M)                        # mean over M maps


def _vmem_budget_bytes():
    """Generation-aware scoped-VMEM budget (bytes) for this kernel."""
    try:
        cap = int(pltpu.get_tpu_info().vmem_capacity_bytes)
    except Exception:
        cap = 64 * 1024 * 1024                 # conservative fallback (v7x-sized VMEM)
    if cap <= 64 * 1024 * 1024:
        # v7x-class (64 MiB / TensorCore): leave headroom for Mosaic scratch/semaphores.
        return min(cap * 3 // 4, 52 * 1024 * 1024)
    # v5e / v6e-class (128 MiB physical): push tiles toward the HBM roofline.
    return min(cap - 24 * 1024 * 1024, 104 * 1024 * 1024)


def _pick_hw_tile(hw, row_bytes, per_buf_bytes):
    """Largest lane-aligned HW tile that divides HW and fits one pipeline buffer."""
    if hw * row_bytes <= per_buf_bytes:
        return hw                              # whole spatial extent fits: single tile
    max_lanes = (per_buf_bytes // row_bytes) // 128 * 128
    t = min(max_lanes, (hw // 128) * 128)
    while t >= 128:
        if hw % t == 0:
            return t
        t -= 128
    # TODO(synk): H*W has no 128-aligned divisor that fits the VMEM budget; fall back to
    # streaming the whole row instead of padding H*W + masking the online softmax.
    return hw


def _pick_batch_tile(batch, block_bytes, per_buf_bytes):
    """Batch tile: amortize per-grid-step overhead, keep >=2 blocks for megacore."""
    target = 4 * 1024 * 1024                   # enough bytes/step to hide ~0.35us fixed cost
    best = 1
    for bt in range(1, batch + 1):
        if batch % bt:
            continue
        if batch >= 2 and batch // bt < 2:
            break                              # keep two grid blocks so both v7x TCs get work
        if bt * block_bytes > per_buf_bytes:
            break
        best = bt
        if bt * block_bytes >= target:
            break
    return best


def spatial_attention_forward(x, w_weight, phi_weight, num_attention_maps, *,
                              hw_tile=None, batch_tile=None):
    """x: [B, C, H, W] (f32, or bf16 end-to-end from the producer -- no in-kernel cast).
    w_weight:   [M, C, 1, 1]     (nn.Conv2d(C, M, 1, bias=False).weight)
    phi_weight: [4*M, C, 1, 1]   (nn.Conv2d(C, 4*M, 1, bias=False).weight)
    returns: [B, 4] float32
    """
    B, C, H, W = x.shape
    M = int(num_attention_maps)
    HW = H * W
    itemsize = x.dtype.itemsize

    budget = _vmem_budget_bytes()
    # Reserve room for the (double-buffered) weights, scratch, output + compiler slack.
    slack = 4 * 1024 * 1024 + 2 * 5 * M * max(C, 128) * 4
    per_buf = max((budget - slack) // 2, 1 << 20)   # one of the two x pipeline buffers

    if hw_tile is None:
        hw_tile = _pick_hw_tile(HW, C * itemsize, per_buf)
    assert HW % hw_tile == 0, "hw_tile must evenly divide H*W"
    num_hw_tiles = HW // hw_tile

    if batch_tile is None:
        batch_tile = (_pick_batch_tile(B, C * hw_tile * itemsize, per_buf)
                      if num_hw_tiles == 1 else 1)
    Bt = int(batch_tile)
    assert B % Bt == 0, "batch_tile must evenly divide B"
    nb = B // Bt
    # TODO(synk): for single-image inference on v7x (nb == 1) split the HW axis across
    # the two TensorCores (per-core partial m/l/p + tiny combine) instead of idling one.

    # Free row-major reshape (no transpose / extra HBM pass): NCHW -> (nb, Bt, C, HW)
    # keeps the spatial axis lane-major inside the kernel.
    x_blk = x.reshape(nb, Bt, C, HW)

    # Tiny weights: W in x's dtype for the streaming matmul; phi reordered to k-major
    # rows (PyTorch phi channel o = m*4 + k  ->  row k*M + m) in f32 for the finalize.
    w2d = w_weight.reshape(M, C).astype(x.dtype)
    phi_km = (phi_weight.reshape(M, 4, C).transpose(1, 0, 2)
              .reshape(4 * M, C).astype(jnp.float32))

    R = ((M + 7) // 8) * 8          # 8-aligned per-batch-element scratch row stride

    kernel = functools.partial(_spatial_attention_kernel,
                               num_maps=M, batch_tile=Bt, row_stride=R)

    out = pl.pallas_call(
        kernel,
        out_shape=jax.ShapeDtypeStruct((nb, Bt, 4), jnp.float32),
        grid_spec=pltpu.PrefetchScalarGridSpec(
            num_scalar_prefetch=0,
            grid=(nb, num_hw_tiles),
            in_specs=[
                # x: one batch-tile per outer step, one HW tile per inner step.
                pl.BlockSpec((None, Bt, C, hw_tile), lambda b, t: (b, 0, 0, t)),
                # Small weights: resident across the whole grid.
                pl.BlockSpec((M, C), lambda b, t: (0, 0)),
                pl.BlockSpec((4 * M, C), lambda b, t: (0, 0)),
            ],
            # Output block resident across the HW (arbitrary) axis; written on last tile.
            out_specs=pl.BlockSpec((None, Bt, 4), lambda b, t: (b, 0, 0)),
            scratch_shapes=[
                pltpu.VMEM((Bt * R, 1), jnp.float32),   # running max
                pltpu.VMEM((Bt * R, 1), jnp.float32),   # running softmax denominator
                pltpu.VMEM((Bt * R, C), jnp.float32),   # running attention-pooled features
            ],
        ),
        compiler_params=pltpu.CompilerParams(
            dimension_semantics=("parallel", "arbitrary"),
            vmem_limit_bytes=int(budget),
        ),
    )(x_blk, w2d, phi_km)

    return out.reshape(B, 4)


def _reference(x, w_weight, phi_weight, M):
    """Pure-JAX (f32) reproduction of the PyTorch forward, for verification."""
    B, C, H, W = x.shape
    HW = H * W
    a = jnp.einsum("bchw,mc->bmhw", x, w_weight.reshape(M, C)).reshape(B, M, HW)
    att = jax.nn.softmax(a, axis=2)[:, :, None, :]                         # [B,M,1,HW]
    s = jnp.einsum("bchw,oc->bohw", x, phi_weight.reshape(4 * M, C)).reshape(B, M, 4, HW)
    cs = jnp.sum(att * s, axis=3)                                          # [B, M, 4]
    return jnp.mean(cs, axis=1)                                            # [B, 4]


if __name__ == "__main__":
    M = 4  # num_attention_maps

    key = jax.random.PRNGKey(0)
    kx, kw, kp, kx2 = jax.random.split(key, 4)

    # Case 1: B=2, C=8, 16x16 -> exercises both the hw-tiled online-softmax path
    # (hw_tile=128 -> 2 tiles) and the default single-tile path (Bt=1, nb=2).
    B, C, H, W = 2, 8, 16, 16
    x = jax.random.normal(kx, (B, C, H, W), dtype=jnp.float32)
    w_weight = jax.random.normal(kw, (M, C, 1, 1), dtype=jnp.float32) * 0.1
    phi_weight = jax.random.normal(kp, (4 * M, C, 1, 1), dtype=jnp.float32) * 0.1

    ref = jax.block_until_ready(_reference(x, w_weight, phi_weight, M))
    out_tiled = jax.block_until_ready(
        spatial_attention_forward(x, w_weight, phi_weight, M, hw_tile=128))
    out_full = jax.block_until_ready(
        spatial_attention_forward(x, w_weight, phi_weight, M))

    assert out_tiled.shape == (B, 4) and out_full.shape == (B, 4)
    assert jnp.allclose(out_tiled, ref, rtol=2e-2, atol=2e-3), (out_tiled, ref)
    assert jnp.allclose(out_full, ref, rtol=2e-2, atol=2e-3), (out_full, ref)

    # Case 2: many small ROIs -> exercises the batch-tiled path (Bt=4, nb=2, HW<128).
    B2, C2, H2, W2 = 8, 8, 8, 8
    x2 = jax.random.normal(kx2, (B2, C2, H2, W2), dtype=jnp.float32)
    ref2 = jax.block_until_ready(_reference(x2, w_weight, phi_weight, M))
    out2 = jax.block_until_ready(
        spatial_attention_forward(x2, w_weight, phi_weight, M, batch_tile=4))
    assert out2.shape == (B2, 4)
    assert jnp.allclose(out2, ref2, rtol=2e-2, atol=2e-3), (out2, ref2)

    print("KERNEL_OK")
</pallas_src>

<mosaic_0001>
module attributes {stable_mosaic.version = 11 : i64} {
  func.func @_spatial_attention_kernel(%arg0: i32, %arg1: i32, %arg2: memref<1x1x8x128xf32, #tpu.memory_space<vmem>>, %arg3: memref<4x8xf32, #tpu.memory_space<vmem>>, %arg4: memref<16x8xf32, #tpu.memory_space<vmem>>, %arg5: memref<1x1x4xf32, #tpu.memory_space<vmem>>, %arg6: memref<8x1xf32, #tpu.memory_space<vmem>>, %arg7: memref<8x1xf32, #tpu.memory_space<vmem>>, %arg8: memref<8x8xf32, #tpu.memory_space<vmem>>) attributes {dimension_semantics = [#tpu.dimension_semantics<parallel>, #tpu.dimension_semantics<arbitrary>], iteration_bounds = array<i64: 2, 2>, scalar_prefetch = 0 : i64, scratch_operands = 3 : i64, tpu.core_type = #tpu.core_type<tc>, window_params = [{transform_indices = @transform_0, window_bounds = array<i64: 1, 1, 8, 128>}, {pipeline_mode = #tpu.pipeline_mode<synchronous>, transform_indices = @transform_1, window_bounds = array<i64: 4, 8>}, {pipeline_mode = #tpu.pipeline_mode<synchronous>, transform_indices = @transform_2, window_bounds = array<i64: 16, 8>}, {transform_indices = @transform_3, window_bounds = array<i64: 1, 1, 4>}]} {
    %c0_i32 = arith.constant 0 : i32
    %0 = arith.cmpi eq, %arg1, %c0_i32 : i32
    %1 = arith.extui %0 : i1 to i32
    %c0_i32_0 = arith.constant 0 : i32
    %2 = arith.cmpi ne, %1, %c0_i32_0 : i32
    scf.if %2 {
      %cst_22 = arith.constant 0xFF800000 : f32
      %32 = vector.broadcast %cst_22 : f32 to vector<8x1xf32>
      %c0_23 = arith.constant 0 : index
      %c0_24 = arith.constant 0 : index
      %33 = vector.load %arg6[%c0_23, %c0_24] : memref<8x1xf32, #tpu.memory_space<vmem>>, vector<8x1xf32>
      tpu.vector_store %arg6[%c0_23, %c0_24], %32 {strides = array<i32>} : memref<8x1xf32, #tpu.memory_space<vmem>>, vector<8x1xf32>,
      %cst_25 = arith.constant 0.000000e+00 : f32
      %34 = vector.broadcast %cst_25 : f32 to vector<8x1xf32>
      %c0_26 = arith.constant 0 : index
      %c0_27 = arith.constant 0 : index
      %35 = vector.load %arg7[%c0_26, %c0_27] : memref<8x1xf32, #tpu.memory_space<vmem>>, vector<8x1xf32>
      tpu.vector_store %arg7[%c0_26, %c0_27], %34 {strides = array<i32>} : memref<8x1xf32, #tpu.memory_space<vmem>>, vector<8x1xf32>,
      %cst_28 = arith.constant 0.000000e+00 : f32
      %36 = vector.broadcast %cst_28 : f32 to vector<8x8xf32>
      %c0_29 = arith.constant 0 : index
      %c0_30 = arith.constant 0 : index
      %37 = vector.load %arg8[%c0_29, %c0_30] : memref<8x8xf32, #tpu.memory_space<vmem>>, vector<8x8xf32>
      tpu.vector_store %arg8[%c0_29, %c0_30], %36 {strides = array<i32>} : memref<8x8xf32, #tpu.memory_space<vmem>>, vector<8x8xf32>,
    } else {
    }
    %c0 = arith.constant 0 : index
    %c0_1 = arith.constant 0 : index
    %3 = vector.load %arg3[%c0, %c0_1] : memref<4x8xf32, #tpu.memory_space<vmem>>, vector<4x8xf32>
    %c0_2 = arith.constant 0 : index
    %c0_3 = arith.constant 0 : index
    %c0_4 = arith.constant 0 : index
    %c0_5 = arith.constant 0 : index
    %4 = vector.load %arg2[%c0_2, %c0_3, %c0_4, %c0_5] : memref<1x1x8x128xf32, #tpu.memory_space<vmem>>, vector<1x1x8x128xf32>
    %5 = vector.shape_cast %4 : vector<1x1x8x128xf32> to vector<8x128xf32>
    %cst = arith.constant dense<0.000000e+00> : vector<4x128xf32>
    %6 = tpu.matmul %3, %5, %cst {dimension_numbers = #tpu.dot_dimension_numbers<[1], [0], [0], [1], [0, 0, 1, 1], [], []>} : vector<4x8xf32>, vector<8x128xf32>, vector<4x128xf32> -> vector<4x128xf32>
    %c0_6 = arith.constant 0 : index
    %c0_7 = arith.constant 0 : index
    %7 = vector.load %arg6[%c0_6, %c0_7] : memref<8x1xf32, #tpu.memory_space<vmem>>, vector<4x1xf32>
    %cst_8 = arith.constant dense<0xFF800000> : vector<4xf32>
    %8 = vector.multi_reduction <maximumf>, %6, %cst_8 [1] : vector<4x128xf32> to vector<4xf32>
    %9 = vector.shape_cast %8 : vector<4xf32> to vector<4x1xf32>
    %10 = arith.maximumf %7, %9 : vector<4x1xf32>
    %11 = arith.subf %7, %10 : vector<4x1xf32>
    %12 = math.exp %11 : vector<4x1xf32>
    %13 = vector.broadcast %10 : vector<4x1xf32> to vector<4x128xf32>
    %14 = arith.subf %6, %13 : vector<4x128xf32>
    %15 = math.exp %14 : vector<4x128xf32>
    %c0_9 = arith.constant 0 : index
    %c0_10 = arith.constant 0 : index
    %16 = vector.load %arg7[%c0_9, %c0_10] : memref<8x1xf32, #tpu.memory_space<vmem>>, vector<4x1xf32>
    %17 = arith.mulf %12, %16 : vector<4x1xf32>
    %cst_11 = arith.constant dense<0.000000e+00> : vector<4xf32>
    %18 = vector.multi_reduction <add>, %15, %cst_11 [1] : vector<4x128xf32> to vector<4xf32>
    %19 = vector.shape_cast %18 : vector<4xf32> to vector<4x1xf32>
    %20 = arith.addf %17, %19 : vector<4x1xf32>
    %c0_12 = arith.constant 0 : index
    %c0_13 = arith.constant 0 : index
    %21 = vector.load %arg7[%c0_12, %c0_13] : memref<8x1xf32, #tpu.memory_space<vmem>>, vector<4x1xf32>
    tpu.vector_store %arg7[%c0_12, %c0_13], %20 {strides = array<i32>} : memref<8x1xf32, #tpu.memory_space<vmem>>, vector<4x1xf32>,
    %cst_14 = arith.constant dense<0.000000e+00> : vector<4x8xf32>
    %22 = tpu.matmul %15, %5, %cst_14 {dimension_numbers = #tpu.dot_dimension_numbers<[1], [1], [0], [0], [0, 0, 1, 0], [], []>} : vector<4x128xf32>, vector<8x128xf32>, vector<4x8xf32> -> vector<4x8xf32>
    %c0_15 = arith.constant 0 : index
    %c0_16 = arith.constant 0 : index
    %23 = vector.load %arg8[%c0_15, %c0_16] : memref<8x8xf32, #tpu.memory_space<vmem>>, vector<4x8xf32>
    %24 = vector.broadcast %12 : vector<4x1xf32> to vector<4x8xf32>
    %25 = arith.mulf %24, %23 : vector<4x8xf32>
    %26 = arith.addf %25, %22 : vector<4x8xf32>
    %c0_17 = arith.constant 0 : index
    %c0_18 = arith.constant 0 : index
    %27 = vector.load %arg8[%c0_17, %c0_18] : memref<8x8xf32, #tpu.memory_space<vmem>>, vector<4x8xf32>
    tpu.vector_store %arg8[%c0_17, %c0_18], %26 {strides = array<i32>} : memref<8x8xf32, #tpu.memory_space<vmem>>, vector<4x8xf32>,
    %c0_19 = arith.constant 0 : index
    %c0_20 = arith.constant 0 : index
    %28 = vector.load %arg6[%c0_19, %c0_20] : memref<8x1xf32, #tpu.memory_space<vmem>>, vector<4x1xf32>
    tpu.vector_store %arg6[%c0_19, %c0_20], %10 {strides = array<i32>} : memref<8x1xf32, #tpu.memory_space<vmem>>, vector<4x1xf32>,
    %c1_i32 = arith.constant 1 : i32
    %29 = arith.cmpi eq, %arg1, %c1_i32 : i32
    %30 = arith.extui %29 : i1 to i32
    %c0_i32_21 = arith.constant 0 : i32
    %31 = arith.cmpi ne, %30, %c0_i32_21 : i32
    scf.if %31 {
      %c0_22 = arith.constant 0 : index
      %c0_23 = arith.constant 0 : index
      %32 = vector.load %arg4[%c0_22, %c0_23] : memref<16x8xf32, #tpu.memory_space<vmem>>, vector<16x8xf32>
      %c0_24 = arith.constant 0 : index
      %c0_25 = arith.constant 0 : index
      %33 = vector.load %arg7[%c0_24, %c0_25] : memref<8x1xf32, #tpu.memory_space<vmem>>, vector<4x1xf32>
      %cst_26 = arith.constant 1.000000e+00 : f32
      %34 = vector.broadcast %cst_26 : f32 to vector<4x1xf32>
      %35 = arith.divf %34, %33 : vector<4x1xf32>
      %c0_27 = arith.constant 0 : index
      %c0_28 = arith.constant 0 : index
      %36 = vector.load %arg8[%c0_27, %c0_28] : memref<8x8xf32, #tpu.memory_space<vmem>>, vector<4x8xf32>
      %37 = vector.broadcast %35 : vector<4x1xf32> to vector<4x8xf32>
      %38 = arith.mulf %36, %37 : vector<4x8xf32>
      %39 = vector.extract_strided_slice %32 {offsets = [0, 0], sizes = [4, 8], strides = [1, 1]} : vector<16x8xf32> to vector<4x8xf32>
      %40 = arith.mulf %39, %38 : vector<4x8xf32>
      %cst_29 = arith.constant dense<0.000000e+00> : vector<4xf32>
      %41 = vector.multi_reduction <add>, %40, %cst_29 [1] : vector<4x8xf32> to vector<4xf32>
      %42 = vector.shape_cast %41 : vector<4xf32> to vector<4x1xf32>
      %cst_30 = arith.constant dense<0.000000e+00> : vector<1xf32>
      %43 = vector.multi_reduction <add>, %42, %cst_30 [0] : vector<4x1xf32> to vector<1xf32>
      %44 = vector.shape_cast %43 : vector<1xf32> to vector<1x1xf32>
      %45 = vector.extract_strided_slice %32 {offsets = [4, 0], sizes = [4, 8], strides = [1, 1]} : vector<16x8xf32> to vector<4x8xf32>
      %46 = arith.mulf %45, %38 : vector<4x8xf32>
      %cst_31 = arith.constant dense<0.000000e+00> : vector<4xf32>
      %47 = vector.multi_reduction <add>, %46, %cst_31 [1] : vector<4x8xf32> to vector<4xf32>
      %48 = vector.shape_cast %47 : vector<4xf32> to vector<4x1xf32>
      %cst_32 = arith.constant dense<0.000000e+00> : vector<1xf32>
      %49 = vector.multi_reduction <add>, %48, %cst_32 [0] : vector<4x1xf32> to vector<1xf32>
      %50 = vector.shape_cast %49 : vector<1xf32> to vector<1x1xf32>
      %51 = vector.extract_strided_slice %32 {offsets = [8, 0], sizes = [4, 8], strides = [1, 1]} : vector<16x8xf32> to vector<4x8xf32>
      %52 = arith.mulf %51, %38 : vector<4x8xf32>
      %cst_33 = arith.constant dense<0.000000e+00> : vector<4xf32>
      %53 = vector.multi_reduction <add>, %52, %cst_33 [1] : vector<4x8xf32> to vector<4xf32>
      %54 = vector.shape_cast %53 : vector<4xf32> to vector<4x1xf32>
      %cst_34 = arith.constant dense<0.000000e+00> : vector<1xf32>
      %55 = vector.multi_reduction <add>, %54, %cst_34 [0] : vector<4x1xf32> to vector<1xf32>
      %56 = vector.shape_cast %55 : vector<1xf32> to vector<1x1xf32>
      %57 = vector.extract_strided_slice %32 {offsets = [12, 0], sizes = [4, 8], strides = [1, 1]} : vector<16x8xf32> to vector<4x8xf32>
      %58 = arith.mulf %57, %38 : vector<4x8xf32>
      %cst_35 = arith.constant dense<0.000000e+00> : vector<4xf32>
      %59 = vector.multi_reduction <add>, %58, %cst_35 [1] : vector<4x8xf32> to vector<4xf32>
      %60 = vector.shape_cast %59 : vector<4xf32> to vector<4x1xf32>
      %cst_36 = arith.constant dense<0.000000e+00> : vector<1xf32>
      %61 = vector.multi_reduction <add>, %60, %cst_36 [0] : vector<4x1xf32> to vector<1xf32>
      %62 = vector.shape_cast %61 : vector<1xf32> to vector<1x1xf32>
      %63 = tpu.concatenate %44, %50, %56, %62 in 1 : vector<1x1xf32>, vector<1x1xf32>, vector<1x1xf32>, vector<1x1xf32> -> vector<1x4xf32>
      %cst_37 = arith.constant 2.500000e-01 : f32
      %64 = vector.broadcast %cst_37 : f32 to vector<1x4xf32>
      %65 = arith.mulf %63, %64 : vector<1x4xf32>
      %c0_38 = arith.constant 0 : index
      %c0_39 = arith.constant 0 : index
      %c0_40 = arith.constant 0 : index
      %66 = vector.load %arg5[%c0_38, %c0_39, %c0_40] : memref<1x1x4xf32, #tpu.memory_space<vmem>>, vector<1x1x4xf32>
      %67 = vector.shape_cast %66 : vector<1x1x4xf32> to vector<1x4xf32>
      %68 = vector.shape_cast %65 : vector<1x4xf32> to vector<1x1x4xf32>
      tpu.vector_store %arg5[%c0_38, %c0_39, %c0_40], %68 {strides = array<i32>} : memref<1x1x4xf32, #tpu.memory_space<vmem>>, vector<1x1x4xf32>,
    } else {
    }
    return
  }
  func.func @transform_0(%arg0: i32, %arg1: i32) -> (i32, i32, i32, i32) {
    %c0_i32 = arith.constant 0 : i32
    %c0_i32_0 = arith.constant 0 : i32
    %c0_i32_1 = arith.constant 0 : i32
    return %arg0, %c0_i32, %c0_i32_0, %arg1 : i32, i32, i32, i32
  }
  func.func @transform_1(%arg0: i32, %arg1: i32) -> (i32, i32) {
    %c0_i32 = arith.constant 0 : i32
    %c0_i32_0 = arith.constant 0 : i32
    %c0_i32_1 = arith.constant 0 : i32
    return %c0_i32, %c0_i32_0 : i32, i32
  }
  func.func @transform_2(%arg0: i32, %arg1: i32) -> (i32, i32) {
    %c0_i32 = arith.constant 0 : i32
    %c0_i32_0 = arith.constant 0 : i32
    %c0_i32_1 = arith.constant 0 : i32
    return %c0_i32, %c0_i32_0 : i32, i32
  }
  func.func @transform_3(%arg0: i32, %arg1: i32) -> (i32, i32, i32) {
    %c0_i32 = arith.constant 0 : i32
    %c0_i32_0 = arith.constant 0 : i32
    %c0_i32_1 = arith.constant 0 : i32
    return %arg0, %c0_i32, %c0_i32_0 : i32, i32, i32
  }
}

</mosaic_0001>

<bundles_post_ra>
// kernel: tpu_custom_call.1
= control target key start
LH: loop header
LB: loop body
LE: loop exit
PB: predicated region body
PF: predicated region fallthrough
CT: control target
= control target key end

     0   :  { %8 = vsyncpa [#allocation6], 0  ;;  %s1133_s0 = inlined_call_operand.hbm [shape: f32[2,1,8,256], index: 0, kind: input, shape index: {}]   ;;  %s1134_s1 = inlined_call_operand.vmem [shape: f32[4,8], index: 1, kind: input, shape index: {}]   ;;  %s1135_s2 = inlined_call_operand.vmem [shape: f32[16,8], index: 2, kind: input, shape index: {}]   ;;  %s1136_s3 = inlined_call_operand.hbm [shape: f32[2,1,4], index: 3, kind: output, shape index: {}]  }
   0x1   :  { %10 = vsyncpa [#allocation6 + $0x1], 0 }
   0x2   :  { %11 = vsyncpa [#allocation7], 0 }
   0x3   :  { %13 = vsyncpa [#allocation7 + $0x1], 0  ;;  %s891_s12 = smov 0   ;;  %s893_s13 = smov 0  }
   0x4   :  { %s895_s14 = smov 0   ;;  %s897_s15 = smov 0  }
   0x5   :  { %s899_s16 = smov 0   ;;  %s901_s17 = smov 0  }
   0x6   :  { %s903_s18 = smov 0   ;;  %s905_s19 = smov 0  }
   0x7   :  { %s907_s20 = smov 0   ;;  %s909_s21 = smov 0  }
   0x8   :  { %s911_s22 = smov 0  }
   0x9 LB: > { %s563_s23 = sadd.s32 4294967295, %s861_s22   ;;  %s564_s24 = sadd.s32 4294967294, %s861_s22   ;;  %s861_s22 = sphi %s911_s22, %s19_s22   ;;  %s857_s21 = sphi %s909_s21, %s1162_s21   ;;  %s853_s20 = sphi %s907_s20, %s1161_s20   ;;  %s849_s19 = sphi %s905_s19, %s1160_s19   ;;  %s845_s18 = sphi %s903_s18, %s1159_s18   ;;  %s841_s17 = sphi %s901_s17, %s1158_s17   ;;  %s837_s16 = sphi %s899_s16, %s1157_s16   ;;  %s833_s15 = sphi %s897_s15, %s1156_s15   ;;  %s829_s14 = sphi %s895_s14, %s1155_s14   ;;  %s825_s13 = sphi %s893_s13, %s1154_s13   ;;  %s821_s12 = sphi %s891_s12, %s1153_s12  }
   0xa   : > { %s28_s25 = sadd.s32 1, %s853_s20  ;;  %s31_s26 = sadd.s32 1, %s857_s21 }
   0xb   : > { %p29_p0 = scmp.ge.s32.totalorder %s28_s25, 2  ;;  %s40_s27 = sadd.s32 1, %s841_s17 }
   0xc   : > { %p47_p1 = scmp.ne.s32.totalorder %s841_s17, %s837_s16  ;;  %p48_p2 = scmp.eq.s32.totalorder %s861_s22, 0 }
   0xd   : > { %s1164_s25 = smov (%p29_p0, %s28_s25), 0  ;;  %s1166_s26 = smov (!%p29_p0, %s31_s26), %s857_s21 }
   0xe   : > { %1140 = sst [smem:[#allocation11_spill]] %s1164_s25  ;;  %s36_s28 = ssub.s32 %s853_s20, %s1164_s25 }
   0xf   : > { %p957_p3 = por %p48_p2, %p47_p1  ;;  %p33_p4 = scmp.ge.s32.totalorder %s1166_s26, 2 }
  0x10   : > { %p53_p5 = scmp.ne.s32.totalorder %s837_s16, %s833_s15  ;;  %p54_p6 = scmp.eq.s32.totalorder %s563_s23, 0 }
  0x11   : > { %s108_s30 = sadd.s32 1, %s829_s14  ;;  %s1168_s26 = smov (%p33_p4, %s1166_s26), 0 }
  0x12   : > { %1142 = sst [smem:[#allocation12_spill]] %s1168_s26  ;;  %p965_p7 = por %p54_p6, %p53_p5 }
  0x13   : > { %p118_p8 = scmp.ne.s32.totalorder %s829_s14, %s825_s13  ;;  %s35_s5 = ssub.s32 %s857_s21, %s1168_s26 }
  0x14   : > { %p119_p9 = scmp.eq.s32.totalorder %s563_s23, 3  ;;  %s37_s6 = sor.u32 %s36_s28, %s35_s5 }
  0x15   : > { %p106_p10 = scmp.eq.s32.totalorder %s35_s5, 0  ;;  %p38_p11 = scmp.eq.s32.totalorder %s37_s6, 0 }
  0x16   : > { %p973_p12 = por %p119_p9, %p118_p8  ;;  %p124_p13 = scmp.ne.s32.totalorder %s825_s13, %s821_s12 }
  0x17   : > { %s978_s8 = scalar_select %p106_p10, %s829_s14, %s108_s30  }
  0x18   : > { %s1144_s7 = scalar_select %p973_p12, 1, 0 }
  0x19   : > { %s981_s9 = scalar_select %p38_p11, %s841_s17, %s40_s27  }
  0x1a   : > { %p125_p0 = scmp.eq.s32.totalorder %s564_s24, 3  ;;  %p604_p1 = scmp.lt.s32.totalorder %s861_s22, 4 }
  0x1b   : > { %s151_s11 = sand.u32 1, %s841_s17   ;;  %s568_s23 = sshll.u32 %s857_s21, 1 }
  0x1c   : > { %p986_p2 = por %p125_p0, %p124_p13  ;;  %s567_s15 = sshll.u32 %s151_s11, 3 }
  0x1d   : > { %s160_s28 = sadd.s32 %s853_s20, %s568_s23  ;;  %s155_s5 = scalar_lea.vmem [#allocation5], %s567_s15 }
  0x1e   : > { %s1145_s10 = scalar_select %p986_p2, 1, 0 }
  0x1f   : > { %s164_s6 = sshll.u32 %s155_s5, 4  ;;  %s569_s26 = sshll.u32 %s160_s28, 7  ;;  %s993_s6 = int_to_ptr.vmem [resolvable:$true] %s164_s6 }
  0x20   : > { %s998_s25 = scalar_lea.hbm %s1133_s0, %s569_s26  ;;  %p1002_p4 = pnand %p604_p1, %p957_p3 }
  0x21   : > { %s152_s15 = scalar_lea.sflag [#allocation6], %s151_s11  ;;  %s709_s23 = scalar_lea.hbm %s998_s25, 128 }
  0x22   : > { %p710_p8 = scmp.ne.s32.totalorder %s998_s25, %s709_s23  ;;  %p711_p9 = pneg %p1002_p4 }
  0x23   : > { %s714_s28 = scalar_lea.hbm %s1133_s0, 512  ;;  %p715_p3 = scmp.lt.u32.totalorder %s998_s25, %s1133_s0 }
  0x24   : > { %p712_p10 = pnand %p711_p9, %p710_p8  ;;  %p716_p13 = scmp.lt.u32.totalorder %s714_s28, %s709_s23 }
  0x25   : > { %p718_p1 = scmp.lt.u32.totalorder %s709_s23, %s998_s25 }
  0x26   : > { %p713_p11 = pneg %p712_p10  ;;  %p717_p0 = por %p716_p13, %p715_p3 }
  0x28   : > { %p719_p5 = por %p718_p1, %p717_p0 }
  0x2a   : > { %p720_p6 = pnand %p719_p5, %p713_p11 }
  0x2c   : > { %723 = shalt.err (!%p720_p6)
}
  0x2d   : > { %s724_s11 = scalar_lea.vmem %s993_s6, 128  ;;  %s863_s27 = smov [#allocation5]  }
  0x2e   : > { %p725_p8 = scmp.ne.s32.totalorder %s993_s6, %s724_s11  ;;  %s729_s26 = sshll.u32 %s863_s27, 4  ;;  %s730_s26 = int_to_ptr.vmem [resolvable:$false] %s729_s26 }
  0x2f   : > { %s731_s29 = scalar_lea.vmem %s730_s26, 256  ;;  %p732_p12 = scmp.lt.s32.totalorder %s993_s6, %s730_s26 }
  0x30   : > { %p727_p10 = pnand %p725_p8, %p711_p9  ;;  %p733_p3 = scmp.lt.s32.totalorder %s731_s29, %s724_s11 }
  0x32   : > { %p728_p2 = pneg %p727_p10  ;;  %p734_p13 = por %p733_p3, %p732_p12 }
  0x34   : > { %p735_p0 = pnand %p734_p13, %p728_p2 }
  0x36   : > { %738 = shalt.err (!%p735_p0)
}
  0x37   : > { %599 = dma.hbm_to_vmem [thread:$0]  (!%p1002_p4), %s998_s25, 128, %s993_s6, %s152_s15  }
  0x38   : > { %p1147_p5 = scmp.lt.s32.totalorder %s861_s22, 5  ;;  %p1148_p6 = scmp.ge.s32.totalorder %s861_s22, 1 }
  0x3a   : > { %p170_p9 = pnand %p1148_p6, %p1147_p5 }
  0x3b   : > { %s175_s23 = sand.u32 (!%p170_p9), 1, %s837_s16  }
  0x3c   : > { %173 = sbr.rel (%p170_p9) target bundleno = 1070 (0x42e), region = 32  ;;  %s571_s28 = sshll.u32 (!%p170_p9), %s175_s23, 3 }
  0x3d   : > { %s176_s5 = scalar_lea.sflag (!%p170_p9), [#allocation6], %s175_s23  ;;  %s179_s30 = scalar_lea.vmem (!%p170_p9), [#allocation5], %s571_s28 }
  0x43   : > { %812 = dma.done.wait (%p965_p7), %s176_s5, 128  }
  0x44   : > { %814 = vsyncadd (%p965_p7), %s176_s5, 4294967168  ;;  %s199_s24 = sand.u32 1, %s825_s13   ;;  %p572_p12 = scmp.ne.s32.totalorder %s845_s18, 0 }
  0x45   : > { %s1045_s25 = scalar_lea.vmem [#allocation8], %s199_s24  ;;  %vm205_vm0 = vcmask (!%p572_p12), 7168   ;;  %vm208_vm1 = vcmask (!%p572_p12), 64512   ;;  %v864_v0 = vmov (!%p572_p12), -inf   ;;  %v865_v1 = vmov (!%p572_p12), 0.0  }
  0x46   : > { %204 = sbr.rel (%p572_p12) target bundleno = 77 (0x4d), region = 40  ;;  %206 = vst.msk [vmem:[#allocation2] sm:$0xff] (!%p572_p12), %vm205_vm0, %v864_v0  ;;  %207 = vst.msk [vmem:[#allocation3] sm:$0xff] (!%p572_p12), %vm205_vm0, %v865_v1 }
  0x47   : > { %209 = vst.msk [vmem:[#allocation4] sm:$0xff] (!%p572_p12), %vm208_vm1, %v865_v1 }
  0x4d PF: > { %v211_v2 = vld [vmem:[%s179_s30] sm:$0xff]  ;;  %vm212_vm2 = vcmask 64512   ;;  %v866_v4 = vmov 0.0   ;;  %vm867_vm3 = vmmov 0   ;;  %vm287_vm4 = vcmask 1043456   ;;  %p574_p7 = scmp.ne.s32.totalorder %s845_s18, 1 }
  0x4e   : > { %v210_v3 = vld [vmem:[%s1134_s1] sm:$0xf]  ;;  %582 = vmatprep.subr.mxu0 %v866_v4  ;;  %584 = vmatprep.mubr.msk.f32.mxu0 %vm867_vm3, %v866_v4  ;;  %v868_v8 = vmov 0   ;;  %vm309_vm5 = vcmask 3072   ;;  %v303_v20 = vld [vmem:[#allocation3] sm:$0xf] }
  0x4f   : > { %583 = vmatpush3.msra.mxu0 %v211_v2  ;;  %587 = vmatprep.subr.mxu1 %v866_v4  ;;  %v286_v9 = vld [vmem:[#allocation2] sm:$0xf]  ;;  %v381_v24 = vld [vmem:[#allocation4] sm:$0xf]  ;;  %vm389_vm6 = vcmask 60416   ;;  %v869_v31 = vmov (!%p574_p7), 0  }
  0x50   : > { %585 = vmatmul.mubr.msk.f32.vlgmr.msra.gmra.mrb[0].mxu0 %vm212_vm2, %v210_v3  ;;  %588 = vmatpush3.xpose.msra.mxu1 %v211_v2  ;;  %v396_v35 = vld [vmem:[%s1135_s2] sm:$0xff] (!%p574_p7)  ;;  %vm423_vm7 = vcmask (!%p574_p7), 64516   ;;  %v397_v39 = vld [vmem:[%s1135_s2 + $0x8] sm:$0xff] (!%p574_p7)  ;;  %vm462_vm8 = vcmask (!%p574_p7), 7168   ;;  %vm464_vm9 = vcmask (!%p574_p7), 15360   ;;  %vm466_vm10 = vcmask (!%p574_p7), 23552  }
  0x51   : > { %589 = vmatprep.mubr.msk.f32.mxu1 %vm867_vm3, %v866_v4  ;;  %700 = vset.pattern.permute.xlu0 %v868_v8  ;;  %vm469_vm11 = vcmask (!%p574_p7), 24576  }
  0x52   : > { %701 = vset.pattern.permute.xlu1 %v868_v8 }
 0x123   : > { %v282_v5 = vpop.f32.mrb[0].mxu0 }
 0x124   : > { %v586_v6 = vpop.f32.mrb[1].mxu0  ;;  %v288_v7 = vsel %vm287_vm4, %v282_v5, -inf }
 0x125   : > { %289 = vmax.xlane.f32.xlu0 %v288_v7 }
 0x1b2   : > { %v290_v10 = vpop.xlane.xlu0 %289 }
 0x1b3   : > { %v291_v11 = vmax.f32 %v286_v9, %v290_v10 }
 0x1b5   : > { %v292_v12 = vsub.f32 %v286_v9, %v291_v11  ;;  %391 = vst.msk [vmem:[#allocation2] sm:$0xf] %vm309_vm5, %v291_v11  ;;  %297 = vperm.xlu0 %700, %v291_v11  }
 0x1b7   : > { %v293_v18 = vmul.f32 1.442695, %v292_v12 }
 0x1b9   : > { %706 = vset.pattern.permute.xlu0 (!%p574_p7), %v869_v31 }
 0x234   : > { %v298_v13 = vpop.permute.xlu0 %297 }
 0x235   : > { %v300_v14 = vsub.f32 %v282_v5, %v298_v13 }
 0x237   : > { %v301_v15 = vmul.f32 1.442695, %v300_v14 }
 0x239   : > { %702 = vpow2.f32 %v301_v15 }
 0x23a   : > { %704 = vpow2.f32 %v293_v18 }
 0x243   : > { %v703_v16 = vpop.eup %702 }
 0x244   : > { %590 = vmatmul.mubr.f32.vlgmr.msra.gmra.mrb[0].mxu1 %v703_v16  ;;  %v305_v17 = vsel %vm287_vm4, %v703_v16, 0.0  ;;  %v705_v19 = vpop.eup %704 }
 0x245   : > { %306 = vadd.xlane.f32.xlu1 %v305_v17  ;;  %v304_v21 = vmul.f32 %v705_v19, %v303_v20 }
 0x256   : > { %384 = vperm.xlu1 %701, %v705_v19  }
 0x2d2   : > { %v307_v22 = vpop.xlane.xlu1 %306 }
 0x2d3   : > { %v308_v23 = vadd.f32 %v307_v22, %v304_v21 }
 0x2d5   : > { %310 = vst.msk [vmem:[#allocation3] sm:$0xf] %vm309_vm5, %v308_v23 }
 0x2d6   : > { %v385_v25 = vpop.permute.xlu1 %384 }
 0x2d7   : > { %v387_v26 = vmul.f32 %v385_v25, %v381_v24 }
 0x2dc   : > { %v398_v30 = vld [vmem:[#allocation3] sm:$0xf] (!%p574_p7) }
 0x2dd   : > { %707 = vrcp.f32 (!%p574_p7), %v398_v30 }
 0x2e7   : > { %v708_v32 = vpop.eup (!%p574_p7), %707 }
 0x2e8   : > { %404 = vperm.xlu0 (!%p574_p7), %706, %v708_v32  }
 0x314   : > { %395 = sbr.rel (%p574_p7) target bundleno = 1045 (0x415), region = 44 }
 0x317   : > { %v377_v27 = vpop.f32.mrb[0].mxu1 }
 0x318   : > { %v388_v28 = vadd.f32 %v387_v26, %v377_v27  ;;  %v591_v29 = vpop.f32.mrb[1].mxu1 }
 0x31a   : > { %390 = vst.msk [vmem:[#allocation4] sm:$0xf] %vm389_vm6, %v388_v28 }
 0x321   : > { %v401_v33 = vld [vmem:[#allocation4] sm:$0xf] }
 0x367   : > { %v405_v34 = vpop.permute.xlu0 %404 }
 0x368   : > { %v407_v36 = vmul.f32 %v405_v34, %v401_v33 }
 0x36a   : > { %v408_v37 = vmul.f32 %v407_v36, %v396_v35  ;;  %v420_v38 = vrot.slane %v407_v36, 4  ;;  %v437_v45 = vmul.f32 %v407_v36, %v397_v39 }
 0x36c   : > { %v409_v40 = vsel %vm389_vm6, %v408_v37, 0.0  ;;  %v422_v41 = vmul.f32 %v420_v38, %v396_v35  ;;  %v448_v42 = vmul.f32 %v420_v38, %v397_v39  ;;  %v438_v46 = vsel %vm389_vm6, %v437_v45, 0.0 }
 0x36d   : > { %410 = vadd.xlane.f32.xlu1 %v409_v40 }
 0x36e   : > { %v424_v43 = vsel %vm423_vm7, %v422_v41, 0.0  ;;  %v449_v44 = vsel %vm423_vm7, %v448_v42, 0.0 }
 0x36f   : > { %425 = vadd.xlane.f32.xlu0 %v424_v43 }
 0x371   : > { %450 = vadd.xlane.f32.xlu1 %v449_v44 }
 0x375   : > { %439 = vadd.xlane.f32.xlu1 %v438_v46 }
 0x3fa   : > { %v411_v47 = vpop.xlane.xlu1 %410 }
 0x3fb   : > { %v412_v48 = vsel %vm287_vm4, %v411_v47, 0.0 }
 0x3fc   : > { %v413_v49 = vrot.slane %v412_v48, 4  ;;  %v426_v50 = vpop.xlane.xlu0 %425 }
 0x3fd   : > { %v428_v51 = vrot.slane %v426_v50, 4 }
 0x3fe   : > { %v414_v52 = vadd.f32 %v413_v49, %v412_v48  ;;  %v451_v53 = vpop.xlane.xlu1 %450 }
 0x3ff   : > { %v430_v54 = vsel %vm287_vm4, %v428_v51, 0.0  ;;  %v453_v55 = vrot.slane %v451_v53, 4 }
 0x400   : > { %v431_v56 = vrot.slane %v430_v54, 4  ;;  %v415_v57 = vrot.slane %v414_v52, 2 }
 0x401   : > { %v455_v58 = vsel %vm287_vm4, %v453_v55, 0.0 }
 0x402   : > { %v432_v59 = vadd.f32 %v431_v56, %v430_v54  ;;  %v456_v60 = vrot.slane %v455_v58, 4  ;;  %v440_v61 = vpop.xlane.xlu1 %439  ;;  %v416_v2 = vadd.f32 %v415_v57, %v414_v52 }
 0x403   : > { %v441_v62 = vsel %vm287_vm4, %v440_v61, 0.0 }
 0x404   : > { %v433_v63 = vrot.slane %v432_v59, 2  ;;  %v457_v0 = vadd.f32 %v456_v60, %v455_v58  ;;  %v442_v1 = vrot.slane %v441_v62, 4  ;;  %v417_v9 = vrot.slane %v416_v2, 1 }
 0x406   : > { %v434_v3 = vadd.f32 %v433_v63, %v432_v59  ;;  %v458_v4 = vrot.slane %v457_v0, 2  ;;  %v443_v5 = vadd.f32 %v442_v1, %v441_v62  ;;  %v418_v14 = vadd.f32 %v417_v9, %v416_v2 }
 0x408   : > { %v435_v6 = vrot.slane %v434_v3, 1  ;;  %v459_v7 = vadd.f32 %v458_v4, %v457_v0  ;;  %v444_v8 = vrot.slane %v443_v5, 2 }
 0x40a   : > { %v445_v10 = vadd.f32 %v444_v8, %v443_v5  ;;  %v436_v11 = vadd.f32 %v435_v6, %v434_v3  ;;  %v460_v12 = vrot.slane %v459_v7, 1 }
 0x40c   : > { %v446_v13 = vrot.slane %v445_v10, 1  ;;  %v463_v16 = vsel %vm462_vm8, %v418_v14, %v436_v11  ;;  %v461_v17 = vadd.f32 %v460_v12, %v459_v7 }
 0x40e   : > { %v447_v15 = vadd.f32 %v446_v13, %v445_v10 }
 0x410   : > { %v465_v18 = vsel %vm464_vm9, %v463_v16, %v447_v15 }
 0x411   : > { %v467_v19 = vsel %vm466_vm10, %v465_v18, %v461_v17 }
 0x412   : > { %v468_v20 = vmul.f32 0.25, %v467_v19 }
 0x414   : > { %470 = vst.msk [vmem:[%s1045_s25] sm:$0x1] %vm469_vm11, %v468_v20 }
 0x415 PF: > { %s575_s18 = sshll.u32 %s849_s19, 4  ;;  %s484_s5 = sshll.u32 %s1045_s25, 4  ;;  %s485_s5 = int_to_ptr.vmem [resolvable:$true] %s484_s5 }
 0x416   : > { %s1074_s28 = scalar_lea.hbm %s1136_s3, %s575_s18  ;;  %s472_s30 = scalar_lea.sflag [#allocation7], %s199_s24 }
 0x417   : > { %s739_s4 = scalar_lea.vmem %s485_s5, 16  ;;  %p1149_p4 = scmp.ne.s32.totalorder %s1144_s7, 0 }
 0x418   : > { %p740_p2 = scmp.ne.s32.totalorder %s485_s5, %s739_s4  ;;  %s870_s6 = smov [#allocation8]  }
 0x419   : > { %s743_s15 = sshll.u32 %s870_s6, 4  ;;  %s744_s15 = int_to_ptr.vmem [resolvable:$false] %s743_s15 }
 0x41a   : > { %p741_p11 = pnand %p740_p2, %p1149_p4  ;;  %s745_s11 = scalar_lea.vmem %s744_s15, 32 }
 0x41b   : > { %p746_p8 = scmp.lt.s32.totalorder %s485_s5, %s744_s15  ;;  %p747_p10 = scmp.lt.s32.totalorder %s745_s11, %s739_s4 }
 0x41c   : > { %p742_p1 = pneg %p741_p11 }
 0x41d   : > { %p748_p3 = por %p747_p10, %p746_p8 }
 0x41f   : > { %p749_p13 = pnand %p748_p3, %p742_p1 }
 0x421   : > { %752 = shalt.err (!%p749_p13)
}
 0x422   : > { %s753_s19 = scalar_lea.hbm %s1074_s28, 16  ;;  %s757_s27 = scalar_lea.hbm %s1136_s3, 32 }
 0x423   : > { %p754_p0 = scmp.ne.s32.totalorder %s1074_s28, %s753_s19  ;;  %p758_p9 = scmp.lt.u32.totalorder %s1074_s28, %s1136_s3 }
 0x424   : > { %p759_p12 = scmp.lt.u32.totalorder %s757_s27, %s753_s19  ;;  %p761_p2 = scmp.lt.u32.totalorder %s753_s19, %s1074_s28 }
 0x425   : > { %p755_p5 = pnand %p754_p0, %p1149_p4 }
 0x426   : > { %p760_p7 = por %p759_p12, %p758_p9 }
 0x427   : > { %p756_p6 = pneg %p755_p5 }
 0x428   : > { %p762_p11 = por %p761_p2, %p760_p7 }
 0x42a   : > { %p763_p1 = pnand %p762_p11, %p756_p6 }
 0x42c   : > { %766 = shalt.err (!%p763_p1)
}
 0x42d   : > { %594 = dma.vmem_to_hbm [thread:$0]  (%p1149_p4), %s485_s5, 16, %s1074_s28, %s472_s30  }
 0x42e PF: > { %p605_p8 = scmp.ge.s32.totalorder %s861_s22, 2  ;;  %s496_s29 = sand.u32 1, %s821_s12  }
 0x42f   : > { %p1150_p10 = scmp.ne.s32.totalorder %s1145_s10, 0  ;;  %s497_s23 = scalar_lea.sflag [#allocation7], %s496_s29 }
 0x431   : > { %p601_p3 = pnand %p605_p8, %p1150_p10 }
 0x433   : > { %816 = dma.done.wait (!%p601_p3), %s497_s23, 16  }
 0x434   : > { %818 = vsyncadd (!%p601_p3), %s497_s23, 4294967280  ;;  %s19_s22 = sadd.s32 1, %s861_s22   ;;  %s1151_s7 = sld [smem:[#allocation11_spill]] }
 0x435   : > { %p16_p13 = scmp.ge.s32.totalorder %s19_s22, 6   ;;  %s1152_s28 = sld [smem:[#allocation12_spill]] }
 0x436   : > { %s1153_s12 = smov %s825_s13  ;;  %s1154_s13 = smov %s829_s14 }
 0x437   : > { %s1155_s14 = smov %s978_s8  ;;  %s1156_s15 = smov %s837_s16 }
 0x438   : > { %s1157_s16 = smov %s841_s17  ;;  %s1158_s17 = smov %s981_s9 }
 0x439   : > { %s1159_s18 = smov %s853_s20  ;;  %s1160_s19 = smov %s857_s21 }
 0x43a   : > { %s1161_s20 = smov %s1151_s7  ;;  %18 = sbr.rel (!%p16_p13) target bundleno = 9 (0x9), region = 85 }
 0x43b   : > { %s1162_s21 = smov %s1152_s28 }
 0x441   :  { %501 = vsyncpa [#allocation6], 1 }
 0x442   :  { %503 = vsyncpa [#allocation6 + $0x1], 1 }
 0x443   :  { %504 = vsyncpa [#allocation7], 1 }
 0x444   :  { %506 = vsyncpa [#allocation7 + $0x1], 1 }

</bundles_post_ra>
